<compile_context>
chip_gen: v7x
topology: tpu7x:2x2x1
jax: 0.10.0
libtpu: 0.0.40
codegen_flags: <defaults>
</compile_context>

<pallas_src>
import functools
import math

import jax
import jax.numpy as jnp
from jax import lax
from jax.experimental import pallas as pl
from jax.experimental.pallas import tpu as pltpu


def _safe_xlogx(v):
    """x*log(x) with the convention 0*log(0) == 0 (matches the td>0 KL guard)."""
    v = float(v)
    return v * math.log(v) if v > 0.0 else 0.0


def _round_up(a, b):
    return (a + b - 1) // b * b


def _label_smoothing_kernel(x_ref, y_ref, sum_ref, cnt_ref, *,
                            padding_idx, confidence, low, c_const):
    i = pl.program_id(1)

    @pl.when(i == 0)
    def _():
        sum_ref[0, 0] = jnp.float32(0.0)
        cnt_ref[0, 0] = jnp.float32(0.0)

    x = x_ref[...].astype(jnp.float32)        # (tn, V)
    y = y_ref[...]                            # (tn, 1) int32

    # Padded / garbage tail rows carry target == padding_idx -> fully masked.
    ignore = (y == padding_idx)               # (tn, 1) bool
    tgt = jnp.where(ignore, 0, y)             # masked_fill(ignore, 0)

    # ---- log-partition per row: z = m + log(sum(exp(x - m))) ----
    m = jnp.max(x, axis=-1, keepdims=True)                        # (tn, 1)
    z = m + jnp.log(jnp.sum(jnp.exp(x - m), axis=-1, keepdims=True))

    # ---- single fused weighted reduce: sum_v td_v * x_v ----
    iota = lax.broadcasted_iota(jnp.int32, x.shape, 1)
    w = jnp.where(iota == tgt, jnp.float32(confidence), jnp.float32(low))
    combined = jnp.sum(w * x, axis=-1, keepdims=True)              # (tn, 1)

    # row KL sum (closed form; sum_v td_v == 1):
    #   sum_v td_v*(log td_v - (x_v - z)) = c_const - combined + z
    row = jnp.float32(c_const) + z - combined
    row = jnp.where(ignore, 0.0, row)
    nonpad = jnp.where(ignore, jnp.float32(0.0), jnp.float32(1.0))

    # Scalar accumulation straight into the resident SMEM output block.
    sum_ref[0, 0] += jnp.sum(row)
    cnt_ref[0, 0] += jnp.sum(nonpad)


def label_smoothing_loss(predictions, targets, *, vocab_size, padding_idx,
                         smoothing, normalize_length=False, num_cores=1,
                         block_rows=None, vmem_budget_bytes=24 * 1024 * 1024):
    """predictions: (B, T, V) float (f32 or bf16), targets: (B, T) int.

    Returns the scalar label-smoothing loss (float32).
    num_cores=1 for v5e/v6e (single TensorCore); pass 2 on v7x.
    """
    B, T, V = predictions.shape
    assert V == vocab_size
    N = B * T
    # f32 count accumulator is exact only up to 2^24 tokens per core.
    assert N < (1 << 24), "token count exceeds exact f32 accumulation range"

    x = predictions.reshape(N, V)              # no copy, no padding of the logits
    y = targets.reshape(N, 1).astype(jnp.int32)

    # ---- VMEM-budgeted row tile ----
    in_bytes = x.dtype.itemsize
    sub = {4: 8, 2: 16, 1: 32}.get(in_bytes, 8)     # sublane packing per dtype
    # double-buffered input block + one f32 working copy (elementwise chains
    # mostly stay in vregs)
    per_row = 2 * V * in_bytes + V * 4
    tn_cap = max(sub, (vmem_budget_bytes // per_row) // sub * sub)
    tn_cap = min(tn_cap, 1024)
    if block_rows is not None:
        tn_cap = _round_up(block_rows, sub)

    rows_per_core = -(-N // num_cores)
    tn = min(tn_cap, _round_up(rows_per_core, sub))
    steps = -(-rows_per_core // tn)
    n_pad = num_cores * steps * tn

    # Only the (tiny) target vector is padded; padded rows carry padding_idx so
    # they contribute nothing.  x keeps its ragged tail (partial last block).
    if n_pad != N:
        y = jnp.pad(y, ((0, n_pad - N), (0, 0)), constant_values=padding_idx)

    confidence = 1.0 - smoothing
    low = smoothing / (vocab_size - 1)
    c_const = _safe_xlogx(confidence) + (vocab_size - 1) * _safe_xlogx(low)

    kernel = functools.partial(
        _label_smoothing_kernel,
        padding_idx=padding_idx, confidence=confidence, low=low, c_const=c_const)

    # Clamp x's block index: a fully out-of-range block (possible only when
    # num_cores > 1 and N is small) re-reads the last valid block; its rows are
    # masked anyway because the corresponding padded targets are padding_idx.
    max_x_block = max(0, -(-N // tn) - 1)

    def x_index_map(p, i):
        return (jnp.minimum(p * steps + i, max_x_block), 0)

    cost = pl.CostEstimate(
        flops=6 * N * V,
        transcendentals=N * V + 2 * N,
        bytes_accessed=N * V * in_bytes + n_pad * 4 + 8 * num_cores)

    s, c = pl.pallas_call(
        kernel,
        out_shape=(jax.ShapeDtypeStruct((num_cores, 1), jnp.float32),
                   jax.ShapeDtypeStruct((num_cores, 1), jnp.float32)),
        grid_spec=pltpu.PrefetchScalarGridSpec(
            num_scalar_prefetch=0,
            grid=(num_cores, steps),
            in_specs=[pl.BlockSpec((tn, V), x_index_map),
                      pl.BlockSpec((tn, 1), lambda p, i: (p * steps + i, 0))],
            out_specs=(pl.BlockSpec((1, 1), lambda p, i: (p, 0),
                                    memory_space=pltpu.SMEM),
                       pl.BlockSpec((1, 1), lambda p, i: (p, 0),
                                    memory_space=pltpu.SMEM))),
        compiler_params=pltpu.CompilerParams(
            dimension_semantics=("parallel", "arbitrary"),
            vmem_limit_bytes=32 * 1024 * 1024),
        cost_estimate=cost,
    )(x, y)

    total = jnp.sum(s)
    count = jnp.sum(c)
    denom = count if normalize_length else jnp.float32(B)
    return total / denom


def _reference(predictions, targets, *, vocab_size, padding_idx, smoothing,
               normalize_length=False):
    """Pure-JAX reference mirroring the PyTorch module (for verification)."""
    B, T, V = predictions.shape
    x = predictions.reshape(-1, V).astype(jnp.float32)
    y = targets.reshape(-1)
    low = smoothing / (vocab_size - 1)
    confidence = 1.0 - smoothing
    ignore = (y == padding_idx)
    tgt = jnp.where(ignore, 0, y)
    td = jnp.full_like(x, low).at[jnp.arange(x.shape[0]), tgt].set(confidence)
    logsm = jax.nn.log_softmax(x, axis=1)
    kl = jnp.where(td > 0, td * (jnp.log(jnp.where(td > 0, td, 1.0)) - logsm), 0.0)
    kl = jnp.where(ignore[:, None], 0.0, kl)
    denom = jnp.sum(~ignore) if normalize_length else B
    return jnp.sum(kl) / denom


if __name__ == "__main__":
    vocab_size = 512
    padding_idx = -1
    smoothing = 0.1

    key = jax.random.PRNGKey(0)

    configs = [
        dict(B=2, T=12, block_rows=None),   # rows divide the block -> single exact block
        dict(B=2, T=13, block_rows=8),      # ragged tail -> partial last block (no x padding)
    ]

    for cfg in configs:
        B, T = cfg["B"], cfg["T"]
        k1, k2, k3, key = jax.random.split(key, 4)
        predictions = jax.random.normal(k1, (B, T, vocab_size), dtype=jnp.float32)
        targets = jax.random.randint(k2, (B, T), 0, vocab_size, dtype=jnp.int32)
        pad_mask = jax.random.bernoulli(k3, 0.25, (B, T))
        targets = jnp.where(pad_mask, padding_idx, targets)

        for normalize_length in (False, True):
            loss = label_smoothing_loss(
                predictions, targets,
                vocab_size=vocab_size, padding_idx=padding_idx,
                smoothing=smoothing, normalize_length=normalize_length,
                block_rows=cfg["block_rows"])
            loss = jax.block_until_ready(loss)

            ref = _reference(
                predictions, targets,
                vocab_size=vocab_size, padding_idx=padding_idx,
                smoothing=smoothing, normalize_length=normalize_length)

            assert jnp.allclose(loss, ref, rtol=1e-5, atol=1e-4), (
                cfg, normalize_length, loss, ref)

    print("KERNEL_OK")
</pallas_src>

<mosaic_0001>
module attributes {stable_mosaic.version = 11 : i64} {
  func.func @_label_smoothing_kernel(%arg0: i32, %arg1: i32, %arg2: memref<24x512xf32, #tpu.memory_space<vmem>>, %arg3: memref<24x1xi32, #tpu.memory_space<vmem>>, %arg4: memref<1x1xf32, #tpu.memory_space<smem>>, %arg5: memref<1x1xf32, #tpu.memory_space<smem>>) attributes {dimension_semantics = [#tpu.dimension_semantics<parallel>, #tpu.dimension_semantics<arbitrary>], iteration_bounds = array<i64: 1, 1>, scalar_prefetch = 0 : i64, scratch_operands = 0 : i64, tpu.core_type = #tpu.core_type<tc>, window_params = [{transform_indices = @transform_0, window_bounds = array<i64: 24, 512>}, {transform_indices = @transform_1, window_bounds = array<i64: 24, 1>}, {transform_indices = @transform_2, window_bounds = array<i64: 1, 1>}, {transform_indices = @transform_3, window_bounds = array<i64: 1, 1>}]} {
    %c0_i32 = arith.constant 0 : i32
    %0 = arith.cmpi eq, %arg1, %c0_i32 : i32
    %1 = arith.extui %0 : i1 to i32
    %c0_i32_0 = arith.constant 0 : i32
    %2 = arith.cmpi ne, %1, %c0_i32_0 : i32
    scf.if %2 {
      %cst_23 = arith.constant 0.000000e+00 : f32
      %c0_24 = arith.constant 0 : index
      %c0_25 = arith.constant 0 : index
      %49 = memref.load %arg4[%c0_24, %c0_25] : memref<1x1xf32, #tpu.memory_space<smem>>
      memref.store %cst_23, %arg4[%c0_24, %c0_25] : memref<1x1xf32, #tpu.memory_space<smem>>
      %cst_26 = arith.constant 0.000000e+00 : f32
      %c0_27 = arith.constant 0 : index
      %c0_28 = arith.constant 0 : index
      %50 = memref.load %arg5[%c0_27, %c0_28] : memref<1x1xf32, #tpu.memory_space<smem>>
      memref.store %cst_26, %arg5[%c0_27, %c0_28] : memref<1x1xf32, #tpu.memory_space<smem>>
    } else {
    }
    %c0 = arith.constant 0 : index
    %c0_1 = arith.constant 0 : index
    %3 = vector.load %arg2[%c0, %c0_1] : memref<24x512xf32, #tpu.memory_space<vmem>>, vector<24x512xf32>
    %c0_2 = arith.constant 0 : index
    %c0_3 = arith.constant 0 : index
    %4 = vector.load %arg3[%c0_2, %c0_3] : memref<24x1xi32, #tpu.memory_space<vmem>>, vector<24x1xi32>
    %c-1_i32 = arith.constant -1 : i32
    %5 = vector.broadcast %c-1_i32 : i32 to vector<24x1xi32>
    %6 = arith.cmpi eq, %4, %5 : vector<24x1xi32>
    %c0_i32_4 = arith.constant 0 : i32
    %7 = vector.broadcast %c0_i32_4 : i32 to vector<24x1xi32>
    %8 = arith.select %6, %7, %4 : vector<24x1xi1>, vector<24x1xi32>
    %cst = arith.constant dense<0xFF800000> : vector<24xf32>
    %9 = vector.multi_reduction <maximumf>, %3, %cst [1] : vector<24x512xf32> to vector<24xf32>
    %10 = vector.shape_cast %9 : vector<24xf32> to vector<24x1xf32>
    %11 = vector.broadcast %10 : vector<24x1xf32> to vector<24x512xf32>
    %12 = arith.subf %3, %11 : vector<24x512xf32>
    %13 = math.exp %12 : vector<24x512xf32>
    %cst_5 = arith.constant dense<0.000000e+00> : vector<24xf32>
    %14 = vector.multi_reduction <add>, %13, %cst_5 [1] : vector<24x512xf32> to vector<24xf32>
    %15 = vector.shape_cast %14 : vector<24xf32> to vector<24x1xf32>
    %16 = math.log %15 : vector<24x1xf32>
    %17 = arith.addf %10, %16 : vector<24x1xf32>
    %18 = tpu.iota {dimensions = array<i32: 1>} : vector<24x512xi32>
    %19 = vector.broadcast %8 : vector<24x1xi32> to vector<24x512xi32>
    %20 = arith.cmpi eq, %18, %19 : vector<24x512xi32>
    %cst_6 = arith.constant 0.899999976 : f32
    %cst_7 = arith.constant 1.95694724E-4 : f32
    %21 = vector.broadcast %cst_6 : f32 to vector<24x512xf32>
    %22 = vector.broadcast %cst_7 : f32 to vector<24x512xf32>
    %23 = arith.select %20, %21, %22 : vector<24x512xi1>, vector<24x512xf32>
    %24 = arith.mulf %23, %3 : vector<24x512xf32>
    %cst_8 = arith.constant dense<0.000000e+00> : vector<24xf32>
    %25 = vector.multi_reduction <add>, %24, %cst_8 [1] : vector<24x512xf32> to vector<24xf32>
    %26 = vector.shape_cast %25 : vector<24xf32> to vector<24x1xf32>
    %cst_9 = arith.constant -0.948719918 : f32
    %27 = vector.broadcast %cst_9 : f32 to vector<24x1xf32>
    %28 = arith.addf %27, %17 : vector<24x1xf32>
    %29 = arith.subf %28, %26 : vector<24x1xf32>
    %cst_10 = arith.constant 0.000000e+00 : f32
    %30 = vector.broadcast %cst_10 : f32 to vector<24x1xf32>
    %31 = arith.select %6, %30, %29 : vector<24x1xi1>, vector<24x1xf32>
    %cst_11 = arith.constant 0.000000e+00 : f32
    %cst_12 = arith.constant 1.000000e+00 : f32
    %32 = vector.broadcast %cst_11 : f32 to vector<24x1xf32>
    %33 = vector.broadcast %cst_12 : f32 to vector<24x1xf32>
    %34 = arith.select %6, %32, %33 : vector<24x1xi1>, vector<24x1xf32>
    %c0_13 = arith.constant 0 : index
    %c0_14 = arith.constant 0 : index
    %35 = memref.load %arg4[%c0_13, %c0_14] : memref<1x1xf32, #tpu.memory_space<smem>>
    %36 = vector.shape_cast %31 : vector<24x1xf32> to vector<1x24x1xf32>
    %cst_15 = arith.constant dense<0.000000e+00> : vector<1xf32>
    %37 = vector.multi_reduction <add>, %36, %cst_15 [1, 2] : vector<1x24x1xf32> to vector<1xf32>
    %38 = vector.shape_cast %37 : vector<1xf32> to vector<1x1x1xf32>
    %39 = vector.extract %38[0, 0, 0] : f32 from vector<1x1x1xf32>
    %40 = arith.addf %35, %39 : f32
    %c0_16 = arith.constant 0 : index
    %c0_17 = arith.constant 0 : index
    %41 = memref.load %arg4[%c0_16, %c0_17] : memref<1x1xf32, #tpu.memory_space<smem>>
    memref.store %40, %arg4[%c0_16, %c0_17] : memref<1x1xf32, #tpu.memory_space<smem>>
    %c0_18 = arith.constant 0 : index
    %c0_19 = arith.constant 0 : index
    %42 = memref.load %arg5[%c0_18, %c0_19] : memref<1x1xf32, #tpu.memory_space<smem>>
    %43 = vector.shape_cast %34 : vector<24x1xf32> to vector<1x24x1xf32>
    %cst_20 = arith.constant dense<0.000000e+00> : vector<1xf32>
    %44 = vector.multi_reduction <add>, %43, %cst_20 [1, 2] : vector<1x24x1xf32> to vector<1xf32>
    %45 = vector.shape_cast %44 : vector<1xf32> to vector<1x1x1xf32>
    %46 = vector.extract %45[0, 0, 0] : f32 from vector<1x1x1xf32>
    %47 = arith.addf %42, %46 : f32
    %c0_21 = arith.constant 0 : index
    %c0_22 = arith.constant 0 : index
    %48 = memref.load %arg5[%c0_21, %c0_22] : memref<1x1xf32, #tpu.memory_space<smem>>
    memref.store %47, %arg5[%c0_21, %c0_22] : memref<1x1xf32, #tpu.memory_space<smem>>
    return
  }
  func.func @transform_0(%arg0: i32, %arg1: i32) -> (i32, i32) {
    %c1_i32 = arith.constant 1 : i32
    %0 = arith.muli %arg0, %c1_i32 : i32
    %1 = arith.addi %0, %arg1 : i32
    %c0_i32 = arith.constant 0 : i32
    %2 = arith.minsi %1, %c0_i32 : i32
    %c0_i32_0 = arith.constant 0 : i32
    %c0_i32_1 = arith.constant 0 : i32
    return %2, %c0_i32_0 : i32, i32
  }
  func.func @transform_1(%arg0: i32, %arg1: i32) -> (i32, i32) {
    %c1_i32 = arith.constant 1 : i32
    %0 = arith.muli %arg0, %c1_i32 : i32
    %1 = arith.addi %0, %arg1 : i32
    %c0_i32 = arith.constant 0 : i32
    %c0_i32_0 = arith.constant 0 : i32
    return %1, %c0_i32 : i32, i32
  }
  func.func @transform_2(%arg0: i32, %arg1: i32) -> (i32, i32) {
    %c0_i32 = arith.constant 0 : i32
    %c0_i32_0 = arith.constant 0 : i32
    return %arg0, %c0_i32 : i32, i32
  }
  func.func @transform_3(%arg0: i32, %arg1: i32) -> (i32, i32) {
    %c0_i32 = arith.constant 0 : i32
    %c0_i32_0 = arith.constant 0 : i32
    return %arg0, %c0_i32 : i32, i32
  }
}

</mosaic_0001>

<bundles_post_ra>
// kernel: tpu_custom_call.1
= control target key start
LH: loop header
LB: loop body
LE: loop exit
PB: predicated region body
PF: predicated region fallthrough
CT: control target
= control target key end

     0   :  { %9 = vsyncpa [#allocation3], 0  ;;  %s634_s0 = inlined_call_operand.hbm [shape: f32[24,512], index: 0, kind: input, shape index: {}]   ;;  %s635_s1 = inlined_call_operand.vmem [shape: s32[24,1], index: 1, kind: input, shape index: {}]   ;;  %s636_s2 = inlined_call_operand.hbm [shape: f32[1,1], index: 2, kind: output, shape index: {0}]   ;;  %s637_s3 = inlined_call_operand.hbm [shape: f32[1,1], index: 3, kind: output, shape index: {1}]  }
   0x1   :  { %10 = vsyncpa [#allocation4], 0 }
   0x2   :  { %11 = vsyncpa [#allocation7], 0  ;;  %s407_s12 = smov [#allocation2]   ;;  %s359_s16 = scalar_lea.hbm %s634_s0, 1536 }
   0x3   :  { %s24_s13 = sshll.u32 %s407_s12, 4  ;;  %p360_p0 = scmp.ne.s32.totalorder %s634_s0, %s359_s16  ;;  %s25_s13 = int_to_ptr.vmem [resolvable:$true] %s24_s13 }
   0x4   :  { %p363_p1 = scmp.lt.u32.totalorder %s359_s16, %s634_s0 }
   0x6   :  { %p365_p2 = pnand %p363_p1, %p360_p0 }
   0x8   :  { %368 = shalt.err (!%p365_p2)
}
   0x9   :  { %s369_s21 = scalar_lea.vmem %s25_s13, 1536  ;;  %p374_p4 = scmp.lt.s32.totalorder %s25_s13, %s25_s13 }
   0xa   :  { %p370_p3 = scmp.ne.s32.totalorder %s25_s13, %s369_s21  ;;  %p375_p5 = scmp.lt.s32.totalorder %s369_s21, %s369_s21 }
   0xc   :  { %p376_p6 = por %p375_p5, %p374_p4 }
   0xe   :  { %p377_p7 = pnand %p376_p6, %p370_p3 }
  0x10   :  { %380 = shalt.err (!%p377_p7)
}
  0x11   :  { %s408_s22 = smov 512   ;;  %s409_s23 = smov 32  }
  0x12   :  { %30 = dma.hbm_to_vmem [thread:$0]  %s634_s0, 1536, %s25_s13, [#allocation3], %s408_s22, %s408_s22, %s409_s23  }
  0x13   :  { %401 = dma.done.wait [#allocation3], 1536  }
  0x14   :  { %402 = vsyncadd [#allocation3], 4294965760  ;;  %v410_v0 = vmov 0   ;;  %v447_v1 = vld [vmem:[#allocation2] sm:$0xff]  ;;  %v449_v2 = vld [vmem:[#allocation2 + $0x8] sm:$0xff]  ;;  %v166_v28 = vlaneseq  ;;  %vm244_vm15 = vcmask 7168  }
  0x15   :  { %327 = vset.pattern.permute.xlu1 %v410_v0  ;;  %328 = vset.pattern.permute.xlu0 %v410_v0  ;;  %v451_v3 = vld [vmem:[#allocation2 + $0x10] sm:$0xff]  ;;  %v453_v4 = vld [vmem:[#allocation2 + $0x18] sm:$0xff]  ;;  %v457_v6 = vld [vmem:[#allocation2 + $0x40] sm:$0xff]  ;;  %v411_v60 = vmov 0.00019569472   ;;  %s381_s7 = scalar_lea.hbm %s636_s2, 16 }
  0x16   :  { %v91_v5 = vmax.f32 %v447_v1, %v451_v3  ;;  %v459_v7 = vld [vmem:[#allocation2 + $0x48] sm:$0xff]  ;;  %v92_v8 = vmax.f32 %v449_v2, %v453_v4  ;;  %v463_v9 = vld [vmem:[#allocation2 + $0x50] sm:$0xff]  ;;  %v465_v10 = vld [vmem:[#allocation2 + $0x58] sm:$0xff]  ;;  %v512_v30 = vand.u32 127, %v166_v28  ;;  %p382_p8 = scmp.ne.s32.totalorder %s636_s2, %s381_s7  ;;  %p385_p9 = scmp.lt.u32.totalorder %s381_s7, %s636_s2 }
  0x17   :  { %v467_v11 = vld [vmem:[#allocation2 + $0x20] sm:$0xff]  ;;  %v101_v12 = vmax.f32 %v457_v6, %v463_v9  ;;  %v102_v13 = vmax.f32 %v459_v7, %v465_v10  ;;  %v473_v14 = vld [vmem:[#allocation2 + $0x28] sm:$0xff]  ;;  %v475_v15 = vld [vmem:[#allocation2 + $0x30] sm:$0xff] }
  0x18   :  { %v477_v16 = vld [vmem:[#allocation2 + $0x38] sm:$0xff]  ;;  %v93_v17 = vmax.f32 %v91_v5, %v92_v8  ;;  %v96_v18 = vmax.f32 %v467_v11, %v475_v15  ;;  %v486_v22 = vld [vmem:[%s635_s1] sm:$0xff]  ;;  %v492_v23 = vld [vmem:[%s635_s1 + $0x10] sm:$0xff]  ;;  %v537_v47 = vadd.s32 128, %v512_v30  ;;  %v544_v54 = vadd.s32 256, %v512_v30  ;;  %p387_p10 = pnand %p385_p9, %p382_p8 }
  0x19   :  { %v97_v19 = vmax.f32 %v473_v14, %v477_v16  ;;  %v103_v20 = vmax.f32 %v101_v12, %v102_v13  ;;  %vm85_vm0 = vcmp.eq.s32.totalorder %v486_v22, 4294967295  ;;  %vm87_vm1 = vcmp.eq.s32.totalorder %v492_v23, 4294967295  ;;  %v501_v25 = vld [vmem:[%s635_s1 + $0x8] sm:$0xff] }
  0x1a   :  { %94 = vmax.xlane.f32.xlu0 %v93_v17  ;;  %v88_v24 = vsel %vm85_vm0, 0, %v486_v22  ;;  %v90_v26 = vsel %vm87_vm1, 0, %v492_v23  ;;  %vm86_vm2 = vcmp.eq.s32.totalorder %v501_v25, 4294967295  ;;  %v551_v59 = vadd.s32 384, %v512_v30 }
  0x1b   :  { %v98_v21 = vmax.f32 %v96_v18, %v97_v19  ;;  %104 = vmax.xlane.f32.xlu1 %v103_v20  ;;  %v89_v27 = vsel %vm86_vm2, 0, %v501_v25 }
  0x1e   :  { %99 = vmax.xlane.f32.xlu0 %v98_v21 }
  0x2c   :  { %172 = vperm.xlu1 %327, %v88_v24  }
  0x30   :  { %178 = vperm.xlu1 %327, %v90_v26  }
  0x34   :  { %175 = vperm.xlu0 %328, %v89_v27  }
  0xa7   :  { %v510_v29 = vpop.xlane.xlu0 %94 }
  0xa8   :  { %v106_v31 = vsub.f32 %v447_v1, %v510_v29  ;;  %v107_v32 = vsub.f32 %v449_v2, %v510_v29  ;;  %v108_v33 = vsub.f32 %v451_v3, %v510_v29  ;;  %v109_v34 = vsub.f32 %v453_v4, %v510_v29  ;;  %v522_v35 = vpop.xlane.xlu1 %104 }
  0xa9   :  { %v114_v36 = vsub.f32 %v457_v6, %v522_v35  ;;  %v115_v37 = vsub.f32 %v459_v7, %v522_v35  ;;  %v116_v41 = vsub.f32 %v463_v9, %v522_v35  ;;  %v117_v43 = vsub.f32 %v465_v10, %v522_v35 }
  0xaa   :  { %v118_v38 = vmul.f32 1.442695, %v106_v31  ;;  %v120_v39 = vmul.f32 1.442695, %v107_v32  ;;  %v122_v40 = vmul.f32 1.442695, %v108_v33 }
  0xab   :  { %v124_v42 = vmul.f32 1.442695, %v109_v34  ;;  %v532_v44 = vpop.xlane.xlu0 %99  ;;  %v134_v45 = vmul.f32 1.442695, %v114_v36  ;;  %v136_v48 = vmul.f32 1.442695, %v115_v37 }
  0xac   :  { %329 = vpow2.f32 %v118_v38  ;;  %v110_v46 = vsub.f32 %v467_v11, %v532_v44  ;;  %v111_v49 = vsub.f32 %v473_v14, %v532_v44  ;;  %v173_v50 = vpop.permute.xlu1 %172  ;;  %v138_v51 = vmul.f32 1.442695, %v116_v41 }
  0xad   :  { %331 = vpow2.f32 %v120_v39  ;;  %v112_v52 = vsub.f32 %v475_v15, %v532_v44  ;;  %v140_v53 = vmul.f32 1.442695, %v117_v43  ;;  %vm180_vm3 = vcmp.eq.s32.totalorder %v512_v30, %v173_v50 }
  0xae   :  { %333 = vpow2.f32 %v122_v40  ;;  %v126_v55 = vmul.f32 1.442695, %v110_v46  ;;  %vm181_vm4 = vcmp.eq.s32.totalorder %v537_v47, %v173_v50  ;;  %v113_v56 = vsub.f32 %v477_v16, %v532_v44 }
  0xaf   :  { %335 = vpow2.f32 %v124_v42  ;;  %v128_v57 = vmul.f32 1.442695, %v111_v49  ;;  %v130_v58 = vmul.f32 1.442695, %v112_v52  ;;  %vm182_vm5 = vcmp.eq.s32.totalorder %v544_v54, %v173_v50 }
  0xb0   :  { %337 = vpow2.f32 %v134_v45  ;;  %v192_v61 = vsel %vm180_vm3, 0.9, %v411_v60  ;;  %v193_v62 = vsel %vm181_vm4, 0.9, %v411_v60  ;;  %v132_v0 = vmul.f32 1.442695, %v113_v56  ;;  %v179_v5 = vpop.permute.xlu1 %178 }
  0xb1   :  { %339 = vpow2.f32 %v136_v48  ;;  %vm183_vm8 = vcmp.eq.s32.totalorder %v551_v59, %v173_v50  ;;  %v194_v12 = vsel %vm182_vm5, 0.9, %v411_v60  ;;  %v204_v13 = vmul.f32 %v192_v61, %v447_v1 }
  0xb2   :  { %341 = vpow2.f32 %v138_v51  ;;  %v205_v17 = vmul.f32 %v193_v62, %v449_v2  ;;  %vm188_vm9 = vcmp.eq.s32.totalorder %v512_v30, %v179_v5  ;;  %vm189_vm10 = vcmp.eq.s32.totalorder %v537_v47, %v179_v5 }
  0xb3   :  { %343 = vpow2.f32 %v140_v53  ;;  %v176_v63 = vpop.permute.xlu0 %175  ;;  %v195_v1 = vsel %vm183_vm8, 0.9, %v411_v60  ;;  %v206_v2 = vmul.f32 %v194_v12, %v451_v3  ;;  %vm190_vm13 = vcmp.eq.s32.totalorder %v544_v54, %v179_v5 }
  0xb4   :  { %345 = vpow2.f32 %v126_v55  ;;  %vm184_vm6 = vcmp.eq.s32.totalorder %v512_v30, %v176_v63  ;;  %vm185_vm7 = vcmp.eq.s32.totalorder %v537_v47, %v176_v63  ;;  %vm186_vm11 = vcmp.eq.s32.totalorder %v544_v54, %v176_v63 }
  0xb5   :  { %347 = vpow2.f32 %v128_v57  ;;  %v196_v19 = vsel %vm184_vm6, 0.9, %v411_v60  ;;  %v197_v20 = vsel %vm185_vm7, 0.9, %v411_v60  ;;  %vm187_vm12 = vcmp.eq.s32.totalorder %v551_v59, %v176_v63 }
  0xb6   :  { %v330_v8 = vpop.eup %329  ;;  %349 = vpow2.f32 %v130_v58  ;;  %v216_v31 = vadd.f32 %v205_v17, %v204_v13  ;;  %v208_v32 = vmul.f32 %v196_v19, %v467_v11  ;;  %v209_v33 = vmul.f32 %v197_v20, %v473_v14 }
  0xb7   :  { %v332_v18 = vpop.eup %331  ;;  %351 = vpow2.f32 %v132_v0  ;;  %v198_v36 = vsel %vm186_vm11, 0.9, %v411_v60  ;;  %v200_v3 = vsel %vm188_vm9, 0.9, %v411_v60  ;;  %v201_v41 = vsel %vm189_vm10, 0.9, %v411_v60 }
  0xb8   :  { %v334_v21 = vpop.eup %333  ;;  %v142_v24 = vadd.f32 %v332_v18, %v330_v8  ;;  %v207_v11 = vmul.f32 %v195_v1, %v453_v4  ;;  %v199_v14 = vsel %vm187_vm12, 0.9, %v411_v60  ;;  %v217_v45 = vadd.f32 %v216_v31, %v206_v2 }
  0xb9   :  { %v336_v26 = vpop.eup %335  ;;  %v210_v46 = vmul.f32 %v198_v36, %v475_v15  ;;  %v221_v48 = vadd.f32 %v209_v33, %v208_v32  ;;  %v212_v51 = vmul.f32 %v200_v3, %v457_v6  ;;  %v213_v47 = vmul.f32 %v201_v41, %v459_v7 }
  0xba   :  { %v338_v27 = vpop.eup %337  ;;  %v143_v28 = vadd.f32 %v334_v21, %v142_v24  ;;  %v211_v4 = vmul.f32 %v199_v14, %v477_v16  ;;  %v202_v53 = vsel %vm190_vm13, 0.9, %v411_v60  ;;  %v218_v56 = vadd.f32 %v217_v45, %v207_v11 }
  0xbb   :  { %v340_v34 = vpop.eup %339  ;;  %v222_v57 = vadd.f32 %v221_v48, %v210_v46  ;;  %vm191_vm14 = vcmp.eq.s32.totalorder %v551_v59, %v179_v5  ;;  %v214_v61 = vmul.f32 %v202_v53, %v463_v9  ;;  %v226_v6 = vadd.f32 %v213_v47, %v212_v51 }
  0xbc   :  { %v342_v37 = vpop.eup %341  ;;  %v144_v38 = vadd.f32 %v336_v26, %v143_v28  ;;  %v152_v39 = vadd.f32 %v340_v34, %v338_v27  ;;  %v203_v7 = vsel %vm191_vm14, 0.9, %v411_v60  ;;  %v412_v31 = vmov 1.0  }
  0xbd   :  { %v344_v40 = vpop.eup %343  ;;  %v223_v16 = vadd.f32 %v222_v57, %v211_v4  ;;  %v215_v62 = vmul.f32 %v203_v7, %v465_v10  ;;  %v227_v54 = vadd.f32 %v226_v6, %v214_v61  ;;  %v240_v32 = vsel %vm85_vm0, 0.0, %v412_v31 }
  0xbe   :  { %v346_v42 = vpop.eup %345  ;;  %145 = vadd.xlane.f32.xlu1 %v144_v38  ;;  %v153_v43 = vadd.f32 %v342_v37, %v152_v39  ;;  %v263_v34 = vsel %vm244_vm15, %v240_v32, 0.0  ;;  %v242_v38 = vsel %vm87_vm1, 0.0, %v412_v31 }
  0xbf   :  { %v348_v49 = vpop.eup %347  ;;  %v228_v63 = vadd.f32 %v227_v54, %v215_v62  ;;  %v266_v14 = vsel %vm244_vm15, %v242_v38, 0.0 }
  0xc0   :  { %v154_v30 = vadd.f32 %v344_v40, %v153_v43  ;;  %v147_v50 = vadd.f32 %v348_v49, %v346_v42  ;;  %v350_v52 = vpop.eup %349 }
  0xc1   :  { %v352_v15 = vpop.eup %351 }
  0xc2   :  { %155 = vadd.xlane.f32.xlu1 %v154_v30  ;;  %v148_v55 = vadd.f32 %v350_v52, %v147_v50 }
  0xc4   :  { %v149_v58 = vadd.f32 %v352_v15, %v148_v55 }
  0xc6   :  { %150 = vadd.xlane.f32.xlu0 %v149_v58  ;;  %219 = vadd.xlane.f32.xlu1 %v218_v56 }
  0xca   :  { %224 = vadd.xlane.f32.xlu1 %v223_v16 }
  0xce   :  { %229 = vadd.xlane.f32.xlu1 %v228_v63 }
 0x14b   :  { %v146_v0 = vpop.xlane.xlu1 %145 }
 0x14c   :  { %353 = vlog2.f32 %v146_v0 }
 0x14f   :  { %v156_v8 = vpop.xlane.xlu1 %155 }
 0x150   :  { %355 = vlog2.f32 %v156_v8 }
 0x153   :  { %v151_v59 = vpop.xlane.xlu0 %150  ;;  %v220_v9 = vpop.xlane.xlu1 %219 }
 0x154   :  { %357 = vlog2.f32 %v151_v59 }
 0x156   :  { %v354_v5 = vpop.eup %353 }
 0x157   :  { %v158_v12 = vmul.f32 0.6931472, %v354_v5  ;;  %v225_v18 = vpop.xlane.xlu1 %224 }
 0x159   :  { %v163_v60 = vadd.f32 %v158_v12, %v510_v29  ;;  %v241_v29 = vsel %vm86_vm2, 0.0, %v412_v31 }
 0x15a   :  { %v356_v13 = vpop.eup %355  ;;  %v264_v36 = vsel %vm244_vm15, %v241_v29, 0.0 }
 0x15b   :  { %v162_v17 = vmul.f32 0.6931472, %v356_v13  ;;  %v231_v19 = vadd.f32 -0.9487199, %v163_v60  ;;  %v230_v2 = vpop.xlane.xlu1 %229  ;;  %v265_v41 = vadd.f32 %v264_v36, %v263_v34 }
 0x15d   :  { %v165_v10 = vadd.f32 %v162_v17, %v522_v35  ;;  %v234_v26 = vsub.f32 %v231_v19, %v220_v9  ;;  %v267_v42 = vadd.f32 %v266_v14, %v265_v41 }
 0x15e   :  { %v358_v20 = vpop.eup %357 }
 0x15f   :  { %v160_v21 = vmul.f32 0.6931472, %v358_v20  ;;  %v233_v24 = vadd.f32 -0.9487199, %v165_v10  ;;  %v237_v35 = vsel %vm85_vm0, 0.0, %v234_v26 }
 0x160   :  { %v245_v39 = vsel %vm244_vm15, %v237_v35, 0.0 }
 0x161   :  { %v164_v1 = vadd.f32 %v160_v21, %v532_v44  ;;  %v236_v28 = vsub.f32 %v233_v24, %v230_v2 }
 0x163   :  { %v232_v27 = vadd.f32 -0.9487199, %v164_v1  ;;  %v239_v37 = vsel %vm87_vm1, 0.0, %v236_v28 }
 0x164   :  { %v248_v11 = vsel %vm244_vm15, %v239_v37, 0.0 }
 0x165   :  { %v235_v33 = vsub.f32 %v232_v27, %v225_v18 }
 0x167   :  { %v238_v44 = vsel %vm86_vm2, 0.0, %v235_v33 }
 0x168   :  { %v246_v40 = vsel %vm244_vm15, %v238_v44, 0.0 }
 0x169   :  { %v247_v3 = vadd.f32 %v246_v40, %v245_v39 }
 0x16b   :  { %v249_v22 = vadd.f32 %v248_v11, %v247_v3 }
 0x16d   :  { %250 = vadd.xlane.f32.xlu1 %v249_v22 }
 0x171   :  { %268 = vadd.xlane.f32.xlu1 %v267_v42 }
 0x1fa   :  { %v251_v43 = vpop.xlane.xlu1 %250 }
 0x1fb   :  { %v252_v45 = vrot.slane %v251_v43, 4 }
 0x1fd   :  { %v253_v25 = vadd.f32 %v252_v45, %v251_v43 }
 0x1fe   :  { %v269_v46 = vpop.xlane.xlu1 %268 }
 0x1ff   :  { %v254_v48 = vrot.slane %v253_v25, 2  ;;  %v270_v49 = vrot.slane %v269_v46, 4 }
 0x201   :  { %v271_v30 = vadd.f32 %v270_v49, %v269_v46  ;;  %v255_v50 = vadd.f32 %v254_v48, %v253_v25 }
 0x203   :  { %v272_v23 = vrot.slane %v271_v30, 2  ;;  %v256_v51 = vrot.slane %v255_v50, 1 }
 0x205   :  { %v273_v47 = vadd.f32 %v272_v23, %v271_v30  ;;  %v257_v52 = vadd.f32 %v256_v51, %v255_v50 }
 0x207   :  { %314 = vpush %v257_v52  ;;  %v274_v4 = vrot.slane %v273_v47, 1 }
 0x209   :  { %v275_v53 = vadd.f32 %v274_v4, %v273_v47 }
 0x20b   :  { %316 = vpush %v275_v53 }
 0x238   :  { %s315_s1 = spop %314 }
 0x239   :  { %261 = sst [smem:[#allocation5]] %s315_s1 }
 0x23c   :  { %s317_s4 = spop %316 }
 0x23d   :  { %390 = shalt.err (!%p387_p10)
}
 0x23e   :  { %s413_s12 = smov [#allocation5]   ;;  %279 = sst [smem:[#allocation6]] %s317_s4 }
 0x23f   :  { %287 = dma.smem_to_hbm %s413_s12, 16, %s636_s2, [#allocation4]  }
 0x240   :  { %s391_s17 = scalar_lea.hbm %s637_s3, 16 }
 0x241   :  { %p392_p11 = scmp.ne.s32.totalorder %s637_s3, %s391_s17  ;;  %p395_p12 = scmp.lt.u32.totalorder %s391_s17, %s637_s3 }
 0x243   :  { %p397_p13 = pnand %p395_p12, %p392_p11 }
 0x245   :  { %400 = shalt.err (!%p397_p13)
}
 0x246   :  { %s414_s22 = smov [#allocation6]  }
 0x247   :  { %295 = dma.smem_to_hbm %s414_s22, 16, %s637_s3, [#allocation7]  }
 0x248   :  { %403 = dma.done.wait [#allocation4], 16  }
 0x249   :  { %404 = vsyncadd [#allocation4], 4294967280 }
 0x24a   :  { %405 = dma.done.wait [#allocation7], 16  }
 0x24b   :  { %406 = vsyncadd [#allocation7], 4294967280 }
 0x24c   :  { %302 = sfence }
 0x24d   :  { %303 = vsyncpa [#allocation3], 1 }
 0x24e   :  { %304 = vsyncpa [#allocation4], 1 }
 0x24f   :  { %305 = vsyncpa [#allocation7], 1 }

</bundles_post_ra>
